<compile_context>
chip_gen: v6e
topology: v6e:2x2x1
jax: 0.10.0
libtpu: 0.0.40
codegen_flags: <defaults>
</compile_context>

<pallas_src>
import jax
import jax.numpy as jnp
from jax.experimental import pallas as pl
from jax.experimental.pallas import tpu as pltpu


def _make_crop_kernel(top, left, ho, wo):
    """Kernel for a block of K (b, c) planes: copy the cropped window out."""
    def kernel(x_ref, o_ref):
        # x_ref: (K, H, W) VMEM block, o_ref: (K, Ho, Wo) VMEM block.
        o_ref[...] = x_ref[:, top:top + ho, left:left + wo]
    return kernel


def _largest_divisor_leq(n, cap):
    """Largest divisor of n that is <= cap (>= 1)."""
    cap = max(1, min(int(cap), int(n)))
    for k in range(cap, 0, -1):
        if n % k == 0:
            return k
    return 1


def crop_pallas(x, crop_list):
    """x: (B, C, H, W), crop_list: (top, bottom, left, right) static ints."""
    top, bottom, left, right = (int(c) for c in crop_list)
    B, C, H, W = x.shape
    Ho = H - top - bottom
    Wo = W - left - right
    assert Ho > 0 and Wo > 0, "crop removes the whole spatial extent"

    N = B * C
    x3 = x.reshape(N, H, W)                       # contiguous view, free
    itemsize = jnp.dtype(x.dtype).itemsize

    # --- choose K = planes per grid step -----------------------------------
    # Double-buffered input + output blocks must stay under a conservative
    # VMEM budget that fits every generation's scoped default (v5e: 16 MiB).
    vmem_budget = 12 * 1024 * 1024
    bytes_per_plane = 2 * (H * W + Ho * Wo) * itemsize   # x2: double-buffering
    k_cap = max(1, vmem_budget // max(1, bytes_per_plane))
    if N >= 2:
        # Keep at least 2 grid steps so v7x's two TensorCores both get work.
        k_cap = min(k_cap, pl.cdiv(N, 2))
    K = _largest_divisor_leq(N, k_cap)
    grid = (N // K,)

    cost = pl.CostEstimate(
        flops=0,
        transcendentals=0,
        bytes_accessed=N * (H * W + Ho * Wo) * itemsize,
    )

    out = pl.pallas_call(
        _make_crop_kernel(top, left, Ho, Wo),
        out_shape=jax.ShapeDtypeStruct((N, Ho, Wo), x.dtype),
        grid=grid,
        in_specs=[pl.BlockSpec((K, H, W), lambda i: (i, 0, 0))],
        out_specs=pl.BlockSpec((K, Ho, Wo), lambda i: (i, 0, 0)),
        compiler_params=pltpu.CompilerParams(
            dimension_semantics=("parallel",)),
        cost_estimate=cost,
    )(x3)

    return out.reshape(B, C, Ho, Wo)


class Crop:
    """Pallas-backed equivalent of the PyTorch Crop nn.Module."""

    def __init__(self, crop_list):
        self.crop_list = tuple(int(c) for c in crop_list)

    def __call__(self, x):
        return crop_pallas(x, self.crop_list)


if __name__ == "__main__":
    key = jax.random.PRNGKey(0)

    B, C, H, W = 2, 4, 16, 16
    crop_list = (2, 1, 3, 2)              # top, bottom, left, right

    x = jax.random.normal(key, (B, C, H, W), jnp.float32)

    crop = Crop(crop_list)
    fwd = jax.jit(crop.__call__)

    y = jax.block_until_ready(fwd(x))

    # Reference: plain slicing, exactly the PyTorch forward.
    y_ref = x[:, :, crop_list[0]:H - crop_list[1], crop_list[2]:W - crop_list[3]]

    assert y.shape == (B, C, H - crop_list[0] - crop_list[1],
                       W - crop_list[2] - crop_list[3]), y.shape
    assert bool(jnp.array_equal(y, y_ref)), "crop mismatch vs reference slicing"
    assert bool(jnp.all(jnp.isfinite(y)))
    print("KERNEL_OK")
</pallas_src>

<mosaic_0001>
module attributes {stable_mosaic.version = 11 : i64} {
  func.func @kernel(%arg0: i32, %arg1: memref<4x16x16xf32, #tpu.memory_space<vmem>>, %arg2: memref<4x13x11xf32, #tpu.memory_space<vmem>>) attributes {dimension_semantics = [#tpu.dimension_semantics<parallel>], iteration_bounds = array<i64: 2>, scalar_prefetch = 0 : i64, scratch_operands = 0 : i64, tpu.core_type = #tpu.core_type<tc>, window_params = [{transform_indices = @transform_0, window_bounds = array<i64: 4, 16, 16>}, {transform_indices = @transform_1, window_bounds = array<i64: 4, 13, 11>}]} {
    %c0 = arith.constant 0 : index
    %c2 = arith.constant 2 : index
    %c3 = arith.constant 3 : index
    %0 = vector.load %arg1[%c0, %c2, %c3] : memref<4x16x16xf32, #tpu.memory_space<vmem>>, vector<4x13x11xf32>
    %c0_0 = arith.constant 0 : index
    %c0_1 = arith.constant 0 : index
    %c0_2 = arith.constant 0 : index
    %1 = vector.load %arg2[%c0_0, %c0_1, %c0_2] : memref<4x13x11xf32, #tpu.memory_space<vmem>>, vector<4x13x11xf32>
    tpu.vector_store %arg2[%c0_0, %c0_1, %c0_2], %0 {strides = array<i32>} : memref<4x13x11xf32, #tpu.memory_space<vmem>>, vector<4x13x11xf32>,
    return
  }
  func.func @transform_0(%arg0: i32) -> (i32, i32, i32) {
    %c0_i32 = arith.constant 0 : i32
    %c0_i32_0 = arith.constant 0 : i32
    %c0_i32_1 = arith.constant 0 : i32
    return %arg0, %c0_i32, %c0_i32_0 : i32, i32, i32
  }
  func.func @transform_1(%arg0: i32) -> (i32, i32, i32) {
    %c0_i32 = arith.constant 0 : i32
    %c0_i32_0 = arith.constant 0 : i32
    %c0_i32_1 = arith.constant 0 : i32
    return %arg0, %c0_i32, %c0_i32_0 : i32, i32, i32
  }
}

</mosaic_0001>

<bundles_post_ra>
// kernel: a_call__.1
= control target key start
LH: loop header
LB: loop body
LE: loop exit
PB: predicated region body
PF: predicated region fallthrough
CT: control target
= control target key end

     0   :  { %6 = vsyncpa [#allocation3], 0  ;;  %s503_s0 = inlined_call_operand.hbm [shape: f32[8,16,16], index: 0, kind: input, shape index: {}]   ;;  %s504_s1 = inlined_call_operand.vmem [shape: f32[8,13,11], index: 1, kind: output, shape index: {}]  }
   0x1   :  { %8 = vsyncpa [#allocation3 + $0x1], 0  ;;  %s399_s6 = smov 0   ;;  %s401_s7 = smov 0  }
   0x2   :  { %s403_s8 = smov 0   ;;  %s405_s9 = smov 0  }
   0x3 LB: > { %s261_s10 = sadd.s32 4294967295, %s383_s9   ;;  %s419_s11 = sadd.s32 1, %s383_s9   ;;  %s383_s9 = sphi %s405_s9, %s513_s9   ;;  %s379_s8 = sphi %s403_s8, %s512_s8   ;;  %s375_s7 = sphi %s401_s7, %s511_s7   ;;  %s371_s6 = sphi %s399_s6, %s510_s6  }
   0x4   : > { %s18_s12 = ssub.s32 %s383_s9, %s419_s11  ;;  %s21_s13 = sadd.s32 1, %s379_s8 }
   0x5   : > { %p19_p0 = scmp.eq.s32.totalorder %s18_s12, 0  ;;  %p28_p1 = scmp.ne.s32.totalorder %s379_s8, %s375_s7 }
   0x6   : > { %p29_p2 = scmp.eq.s32.totalorder %s383_s9, 0  ;;  %p34_p3 = scmp.ne.s32.totalorder %s375_s7, %s371_s6 }
   0x7   : > { %s429_s14 = scalar_select %p19_p0, %s379_s8, %s21_s13  }
   0x8   : > { %p30_p4 = por %p29_p2, %p28_p1  ;;  %p35_p5 = scmp.eq.s32.totalorder %s261_s10, 0 }
   0x9   : > { %p285_p6 = scmp.lt.s32.totalorder %s383_s9, 2  ;;  %s84_s16 = sand.u32 1, %s379_s8  }
   0xa   : > { %p434_p7 = por %p35_p5, %p34_p3  ;;  %s265_s17 = sshll.u32 %s84_s16, 6 }
   0xb   : > { %s277_s18 = sshll.u32 %s383_s9, 10  ;;  %s88_s22 = scalar_lea.vmem [#allocation2], %s265_s17 }
   0xc   : > { %s506_s15 = scalar_select %p434_p7, 1, 0 }
   0xd   : > { %s443_s21 = scalar_lea.hbm %s503_s0, %s277_s18  ;;  %s96_s23 = sshll.u32 %s88_s22, 4  ;;  %s445_s23 = int_to_ptr.vmem [resolvable:$true] %s96_s23 }
   0xe   : > { %p447_p8 = pnand %p285_p6, %p30_p4  ;;  %s452_s25 = scalar_lea.sflag [#allocation3], %s84_s16 }
   0xf   : > { %s321_s26 = scalar_lea.hbm %s443_s21, 1024  ;;  %s326_s29 = scalar_lea.hbm %s503_s0, 2048 }
  0x10   : > { %p322_p10 = scmp.ne.s32.totalorder %s443_s21, %s321_s26  ;;  %p323_p11 = pneg %p447_p8 }
  0x11   : > { %p327_p0 = scmp.lt.s32.totalorder %s443_s21, %s503_s0  ;;  %p328_p1 = scmp.lt.s32.totalorder %s326_s29, %s321_s26 }
  0x12   : > { %p324_p12 = pnand %p323_p11, %p322_p10 }
  0x13   : > { %p329_p2 = por %p328_p1, %p327_p0 }
  0x14   : > { %p325_p13 = pneg %p324_p12 }
  0x16   : > { %p330_p3 = pnand %p329_p2, %p325_p13 }
  0x18   : > { %333 = shalt.err (!%p330_p3)
}
  0x19   : > { %s334_s3 = scalar_lea.vmem %s445_s23, 1024  ;;  %s385_s4 = smov [#allocation2]  }
  0x1a   : > { %p335_p4 = scmp.ne.s32.totalorder %s445_s23, %s334_s3  ;;  %s339_s5 = sshll.u32 %s385_s4, 4  ;;  %s340_s5 = int_to_ptr.vmem [resolvable:$false] %s339_s5 }
  0x1b   : > { %s341_s6 = scalar_lea.vmem %s340_s5, 2048  ;;  %p342_p10 = scmp.lt.s32.totalorder %s445_s23, %s340_s5 }
  0x1c   : > { %p337_p5 = pnand %p335_p4, %p323_p11  ;;  %p343_p12 = scmp.lt.s32.totalorder %s341_s6, %s334_s3 }
  0x1e   : > { %p338_p6 = pneg %p337_p5  ;;  %p344_p9 = por %p343_p12, %p342_p10 }
  0x20   : > { %p345_p7 = pnand %p344_p9, %p338_p6 }
  0x22   : > { %348 = shalt.err (!%p345_p7)
}
  0x23   : > { %s386_s12 = smov 128   ;;  %s387_s13 = smov 8  }
  0x24   : > { %284 = dma.hbm_to_vmem [thread:$0]  (!%p447_p8), %s443_s21, 1024, %s445_s23, %s452_s25, %s386_s12, %s386_s12, %s387_s13  }
  0x25   : > { %p104_p11 = scmp.lt.s32.totalorder %s383_s9, 3  ;;  %p508_p13 = scmp.ge.s32.totalorder %s383_s9, 1 }
  0x27   : > { %p105_p0 = pnand %p508_p13, %p104_p11 }
  0x28   : > { %s110_s16 = sand.u32 (!%p105_p0), 1, %s375_s7   ;;  %p509_p7 = scmp.ne.s32.totalorder (!%p105_p0), %s506_s15, 0 }
  0x29   : > { %108 = sbr.rel (%p105_p0) target bundleno = 177 (0xb1), region = 24  ;;  %s270_s17 = sshll.u32 (!%p105_p0), %s110_s16, 6 }
  0x2a   : > { %s111_s18 = scalar_lea.sflag (!%p105_p0), [#allocation3], %s110_s16  ;;  %s114_s19 = scalar_lea.vmem (!%p105_p0), [#allocation2], %s270_s17 }
  0x2e   : > { %366 = dma.done.wait (%p509_p7), %s111_s18, 1024  }
  0x2f   : > { %368 = vsyncadd (%p509_p7), %s111_s18, 4294966272  ;;  %v144_v0 = vld [vmem:[%s114_s19 + $0x12] sm:$0xff]  ;;  %v142_v1 = vld [vmem:[%s114_s19 + $0x2] sm:$0xff]  ;;  %s388_s20 = smov 125   ;;  %s271_s15 = sshll.u32 %s261_s10, 2  ;;  %vm182_vm0 = vcmask 89088  }
  0x30   : > { %162 = vrot.lane.b32.xlu1 %v144_v0, %s388_s20  ;;  %158 = vrot.lane.b32.xlu0 %v142_v1, %s388_s20  ;;  %v145_v2 = vld [vmem:[%s114_s19 + $0x1a] sm:$0x1f]  ;;  %v143_v3 = vld [vmem:[%s114_s19 + $0xa] sm:$0x1f]  ;;  %p136_p8 = scmp.lt.s32.totalorder %s271_s15, 7  ;;  %vm184_vm1 = vcmask 86016  }
  0x31   : > { %v147_v4 = vld [vmem:[%s114_s19 + $0x2a] sm:$0x1f]  ;;  %v146_v5 = vld [vmem:[%s114_s19 + $0x22] sm:$0xff]  ;;  %v149_v6 = vld [vmem:[%s114_s19 + $0x3a] sm:$0x1f] }
  0x32   : > { %v148_v7 = vld [vmem:[%s114_s19 + $0x32] sm:$0xff]  ;;  %s515_s15 = smov (!%p136_p8, %s271_s15), 7 }
  0x33   : > { %s278_s21 = sshll.u32 %s515_s15, 4 }
  0x34   : > { %164 = vrot.lane.b32.xlu1 %v145_v2, %s388_s20  ;;  %160 = vrot.lane.b32.xlu0 %v143_v3, %s388_s20  ;;  %s140_s24 = scalar_lea.vmem %s504_s1, %s278_s21 }
  0x38   : > { %168 = vrot.lane.b32.xlu1 %v147_v4, %s388_s20  ;;  %166 = vrot.lane.b32.xlu0 %v146_v5, %s388_s20 }
  0x3c   : > { %172 = vrot.lane.b32.xlu1 %v149_v6, %s388_s20  ;;  %170 = vrot.lane.b32.xlu0 %v148_v7, %s388_s20 }
  0xa2   : > { %v163_v8 = vpop.permute.xlu1 %162  ;;  %v159_v9 = vpop.permute.xlu0 %158 }
  0xa3   : > { %183 = vst.msk [vmem:[%s140_s24] sm:$0xff] %vm182_vm0, %v159_v9  ;;  %186 = vst.msk [vmem:[%s140_s24 + $0x10] sm:$0xff] %vm182_vm0, %v163_v8 }
  0xa6   : > { %v165_v10 = vpop.permute.xlu1 %164  ;;  %v161_v11 = vpop.permute.xlu0 %160 }
  0xa7   : > { %185 = vst.msk [vmem:[%s140_s24 + $0x8] sm:$0x1f] %vm184_vm1, %v161_v11  ;;  %187 = vst.msk [vmem:[%s140_s24 + $0x18] sm:$0x1f] %vm184_vm1, %v165_v10 }
  0xaa   : > { %v169_v12 = vpop.permute.xlu1 %168  ;;  %v167_v13 = vpop.permute.xlu0 %166 }
  0xab   : > { %189 = vst.msk [vmem:[%s140_s24 + $0x28] sm:$0x1f] %vm184_vm1, %v169_v12 }
  0xac   : > { %188 = vst.msk [vmem:[%s140_s24 + $0x20] sm:$0xff] %vm182_vm0, %v167_v13 }
  0xae   : > { %v173_v14 = vpop.permute.xlu1 %172  ;;  %v171_v15 = vpop.permute.xlu0 %170 }
  0xaf   : > { %191 = vst.msk [vmem:[%s140_s24 + $0x38] sm:$0x1f] %vm184_vm1, %v173_v14 }
  0xb0   : > { %190 = vst.msk [vmem:[%s140_s24 + $0x30] sm:$0xff] %vm182_vm0, %v171_v15 }
  0xb1 PF: > { %p11_p9 = scmp.ge.s32.totalorder %s419_s11, 4   ;;  %s510_s6 = smov %s375_s7 }
  0xb2   : > { %s511_s7 = smov %s379_s8  ;;  %s512_s8 = smov %s429_s14 }
  0xb3   : > { %s513_s9 = smov %s419_s11  ;;  %13 = sbr.rel (!%p11_p9) target bundleno = 3 (0x3), region = 64 }
  0xb8   :  { %216 = vsyncpa [#allocation3], 1 }
  0xb9   :  { %218 = vsyncpa [#allocation3 + $0x1], 1 }

</bundles_post_ra>
